<compile_context>
chip_gen: v6e
topology: v6e:2x2x1
jax: 0.10.0
libtpu: 0.0.40
codegen_flags: <defaults>
</compile_context>

<pallas_src>
import jax
import jax.numpy as jnp
from jax.experimental import pallas as pl
from jax.experimental.pallas import tpu as pltpu


def _round_up(x, m):
    return ((x + m - 1) // m) * m


# ----------------------------------------------------------------------------
# Fused kernel:  y = sum_f (x @ W_f + b_f)
# ----------------------------------------------------------------------------

def _parallel_linear_kernel(x_ref, w_ref, b_ref, o_ref):
    """One (M-tile i, branch f, K-tile k) grid step.

    The output BlockSpec maps every (f, k) of a given M tile to the same
    (tm, N) block, so o_ref stays VMEM-resident and acts as the f32
    accumulator across both reduction axes.
    """
    f = pl.program_id(1)
    k = pl.program_id(2)

    @pl.when((f == 0) & (k == 0))
    def _():
        o_ref[...] = jnp.zeros_like(o_ref)

    # Per-branch bias, added exactly once per branch.
    @pl.when(k == 0)
    def _():
        o_ref[...] += b_ref[...]

    # bf16 operands -> MXU, f32 accumulation into the resident output block.
    o_ref[...] += jnp.dot(x_ref[...], w_ref[...],
                          preferred_element_type=jnp.float32)


def parallel_linear_sum(x, Ws, bs, *, tm=128, tk=512):
    """Forward of Parallel(Linear_1, ..., Linear_F):  sum_f (x @ Ws[f] + bs[f]).

    x  : (..., K) float
    Ws : (F, K, N)
    bs : (F, N)
    returns (..., N) float32
    """
    lead = x.shape[:-1]
    K = x.shape[-1]
    F, K2, N = Ws.shape
    assert K2 == K and bs.shape == (F, N)

    x2 = x.reshape(-1, K)
    M = x2.shape[0]

    # MXU-friendly dtypes: bf16 operands, f32 accumulate.
    x2 = x2.astype(jnp.bfloat16)
    Ws = Ws.astype(jnp.bfloat16)
    bs2 = bs.astype(jnp.float32).reshape(F, 1, N)

    # --- M tiling (second-to-last block dims need multiples of 8, or full dim).
    tm = min(tm, _round_up(M, 8))
    Mp = _round_up(M, tm)
    if Mp != M:
        x2 = jnp.pad(x2, ((0, Mp - M), (0, 0)))

    # --- K tiling: full-K block when it fits (no wasteful padding to tk).
    if K <= tk:
        tk = K          # block dim == full array dim: exempt from 128-divisibility
        Kp = K
    else:
        tk = _round_up(tk, 128)
        Kp = _round_up(K, tk)
        if Kp != K:
            x2 = jnp.pad(x2, ((0, 0), (0, Kp - K)))
            Ws = jnp.pad(Ws, ((0, 0), (0, Kp - K), (0, 0)))
    nm = Mp // tm
    nk = Kp // tk

    out = pl.pallas_call(
        _parallel_linear_kernel,
        out_shape=jax.ShapeDtypeStruct((Mp, N), jnp.float32),
        grid=(nm, F, nk),
        in_specs=[
            pl.BlockSpec((tm, tk), lambda i, f, k: (i, k)),          # x tile
            pl.BlockSpec((None, tk, N), lambda i, f, k: (f, k, 0)),  # W_f tile
            pl.BlockSpec((None, 1, N), lambda i, f, k: (f, 0, 0)),   # b_f
        ],
        out_specs=pl.BlockSpec((tm, N), lambda i, f, k: (i, 0)),
        compiler_params=pltpu.CompilerParams(
            dimension_semantics=("parallel", "arbitrary", "arbitrary")),
    )(x2, Ws, bs2)

    return out[:M].reshape(*lead, N)


# ----------------------------------------------------------------------------
# Generic Parallel: the module's own op (sum over branch outputs) as a kernel
# ----------------------------------------------------------------------------

def _branch_sum_kernel(y_ref, o_ref):
    f = pl.program_id(1)

    @pl.when(f == 0)
    def _():
        o_ref[...] = jnp.zeros_like(o_ref)

    o_ref[...] += y_ref[...]


def pallas_branch_sum(ys, *, tm=256):
    """Sum over the leading (branch) axis: (F, M, N) -> (M, N)."""
    F, M, N = ys.shape
    tm = min(tm, _round_up(M, 8))
    Mp = _round_up(M, tm)
    if Mp != M:
        ys = jnp.pad(ys, ((0, 0), (0, Mp - M), (0, 0)))
    out = pl.pallas_call(
        _branch_sum_kernel,
        out_shape=jax.ShapeDtypeStruct((Mp, N), ys.dtype),
        grid=(Mp // tm, F),
        in_specs=[pl.BlockSpec((None, tm, N), lambda i, f: (f, i, 0))],
        out_specs=pl.BlockSpec((tm, N), lambda i, f: (i, 0)),
        compiler_params=pltpu.CompilerParams(
            dimension_semantics=("parallel", "arbitrary")),
    )(ys)
    return out[:M]


class Parallel:
    """Pallas port of `Parallel`: forward(x) = sum(fn(x) for fn in self.fns).

    Branch sub-modules are arbitrary callables; the sum (the module's own
    computation) runs in a tiled Pallas reduction kernel.
    """
    # TODO(synk): arbitrary non-affine sub-modules keep their own kernels; only
    # affine branches can be fused end-to-end (see ParallelLinear below).

    def __init__(self, *fns):
        self.fns = fns

    def __call__(self, x):
        ys = jnp.stack([fn(x) for fn in self.fns], axis=0)
        lead = ys.shape[1:-1]
        N = ys.shape[-1]
        out = pallas_branch_sum(ys.reshape(len(self.fns), -1, N))
        return out.reshape(*lead, N)


class ParallelLinear:
    """Fast path: Parallel(nn.Linear, ..., nn.Linear) — every branch matmul,
    its bias, and the final sum fused into a single Pallas kernel."""

    def __init__(self, Ws, bs):
        self.Ws = jnp.asarray(Ws)
        self.bs = jnp.asarray(bs)

    def __call__(self, x):
        return parallel_linear_sum(x, self.Ws, self.bs)


# ----------------------------------------------------------------------------

if __name__ == "__main__":
    key = jax.random.PRNGKey(0)
    kx, kw, kb = jax.random.split(key, 3)

    B, S, d_in, d_out, F = 4, 128, 256, 256, 3
    x = jax.random.normal(kx, (B, S, d_in), jnp.float32)
    Ws = jax.random.normal(kw, (F, d_in, d_out), jnp.float32) * (1.0 / d_in) ** 0.5
    bs = jax.random.normal(kb, (F, d_out), jnp.float32) * 0.1

    # --- fused path -----------------------------------------------------------
    fused = ParallelLinear(Ws, bs)
    y = jax.jit(lambda t: fused(t))(x)
    jax.block_until_ready(y)

    # --- generic path (branches as callables; sum runs in Pallas) ------------
    branches = [
        (lambda t, f=f: t.astype(jnp.bfloat16).astype(jnp.float32)
         @ Ws[f].astype(jnp.bfloat16).astype(jnp.float32) + bs[f])
        for f in range(F)
    ]
    generic = Parallel(*branches)
    y_gen = jax.jit(lambda t: generic(t))(x)
    jax.block_until_ready(y_gen)

    # --- reference (same bf16 operand rounding, f32 accumulation) ------------
    xb = x.astype(jnp.bfloat16).astype(jnp.float32)
    Wb = Ws.astype(jnp.bfloat16).astype(jnp.float32)
    ref = sum(xb @ Wb[f] + bs[f] for f in range(F))

    assert y.shape == (B, S, d_out), y.shape
    assert y_gen.shape == (B, S, d_out), y_gen.shape
    assert bool(jnp.all(jnp.isfinite(y)))
    err_fused = float(jnp.max(jnp.abs(y - ref)))
    err_gen = float(jnp.max(jnp.abs(y_gen - ref)))
    assert err_fused < 1e-2, err_fused
    assert err_gen < 1e-2, err_gen
    print("KERNEL_OK")
</pallas_src>

<mosaic_0001>
module attributes {stable_mosaic.version = 11 : i64} {
  func.func @_parallel_linear_kernel(%arg0: i32, %arg1: i32, %arg2: i32, %arg3: memref<128x256xbf16, #tpu.memory_space<vmem>>, %arg4: memref<1x256x256xbf16, #tpu.memory_space<vmem>>, %arg5: memref<1x1x256xf32, #tpu.memory_space<vmem>>, %arg6: memref<128x256xf32, #tpu.memory_space<vmem>>) attributes {dimension_semantics = [#tpu.dimension_semantics<parallel>, #tpu.dimension_semantics<arbitrary>, #tpu.dimension_semantics<arbitrary>], iteration_bounds = array<i64: 4, 3, 1>, scalar_prefetch = 0 : i64, scratch_operands = 0 : i64, tpu.core_type = #tpu.core_type<tc>, window_params = [{transform_indices = @transform_0, window_bounds = array<i64: 128, 256>}, {transform_indices = @transform_1, window_bounds = array<i64: 1, 256, 256>}, {transform_indices = @transform_2, window_bounds = array<i64: 1, 1, 256>}, {transform_indices = @transform_3, window_bounds = array<i64: 128, 256>}]} {
    %c0_i32 = arith.constant 0 : i32
    %0 = arith.cmpi eq, %arg1, %c0_i32 : i32
    %c0_i32_0 = arith.constant 0 : i32
    %1 = arith.cmpi eq, %arg2, %c0_i32_0 : i32
    %2 = arith.andi %0, %1 : i1
    %3 = arith.extui %2 : i1 to i32
    %c0_i32_1 = arith.constant 0 : i32
    %4 = arith.cmpi ne, %3, %c0_i32_1 : i32
    scf.if %4 {
      %cst_12 = arith.constant 0.000000e+00 : f32
      %15 = vector.broadcast %cst_12 : f32 to vector<128x256xf32>
      %c0_13 = arith.constant 0 : index
      %c0_14 = arith.constant 0 : index
      %16 = vector.load %arg6[%c0_13, %c0_14] : memref<128x256xf32, #tpu.memory_space<vmem>>, vector<128x256xf32>
      tpu.vector_store %arg6[%c0_13, %c0_14], %15 {strides = array<i32>} : memref<128x256xf32, #tpu.memory_space<vmem>>, vector<128x256xf32>,
    } else {
    }
    %c0_i32_2 = arith.constant 0 : i32
    %5 = arith.cmpi eq, %arg2, %c0_i32_2 : i32
    %6 = arith.extui %5 : i1 to i32
    %c0_i32_3 = arith.constant 0 : i32
    %7 = arith.cmpi ne, %6, %c0_i32_3 : i32
    scf.if %7 {
      %c0_12 = arith.constant 0 : index
      %c0_13 = arith.constant 0 : index
      %15 = vector.load %arg6[%c0_12, %c0_13] : memref<128x256xf32, #tpu.memory_space<vmem>>, vector<128x256xf32>
      %c0_14 = arith.constant 0 : index
      %c0_15 = arith.constant 0 : index
      %c0_16 = arith.constant 0 : index
      %16 = vector.load %arg5[%c0_14, %c0_15, %c0_16] : memref<1x1x256xf32, #tpu.memory_space<vmem>>, vector<1x1x256xf32>
      %17 = vector.shape_cast %16 : vector<1x1x256xf32> to vector<1x256xf32>
      %18 = vector.broadcast %17 : vector<1x256xf32> to vector<128x256xf32>
      %19 = arith.addf %15, %18 : vector<128x256xf32>
      %c0_17 = arith.constant 0 : index
      %c0_18 = arith.constant 0 : index
      %20 = vector.load %arg6[%c0_17, %c0_18] : memref<128x256xf32, #tpu.memory_space<vmem>>, vector<128x256xf32>
      tpu.vector_store %arg6[%c0_17, %c0_18], %19 {strides = array<i32>} : memref<128x256xf32, #tpu.memory_space<vmem>>, vector<128x256xf32>,
    } else {
    }
    %c0 = arith.constant 0 : index
    %c0_4 = arith.constant 0 : index
    %8 = vector.load %arg6[%c0, %c0_4] : memref<128x256xf32, #tpu.memory_space<vmem>>, vector<128x256xf32>
    %c0_5 = arith.constant 0 : index
    %c0_6 = arith.constant 0 : index
    %9 = vector.load %arg3[%c0_5, %c0_6] : memref<128x256xbf16, #tpu.memory_space<vmem>>, vector<128x256xbf16>
    %c0_7 = arith.constant 0 : index
    %c0_8 = arith.constant 0 : index
    %c0_9 = arith.constant 0 : index
    %10 = vector.load %arg4[%c0_7, %c0_8, %c0_9] : memref<1x256x256xbf16, #tpu.memory_space<vmem>>, vector<1x256x256xbf16>
    %11 = vector.shape_cast %10 : vector<1x256x256xbf16> to vector<256x256xbf16>
    %cst = arith.constant dense<0.000000e+00> : vector<128x256xf32>
    %12 = tpu.matmul %9, %11, %cst {dimension_numbers = #tpu.dot_dimension_numbers<[1], [0], [0], [1], [0, 0, 1, 1], [], []>} : vector<128x256xbf16>, vector<256x256xbf16>, vector<128x256xf32> -> vector<128x256xf32>
    %13 = arith.addf %8, %12 : vector<128x256xf32>
    %c0_10 = arith.constant 0 : index
    %c0_11 = arith.constant 0 : index
    %14 = vector.load %arg6[%c0_10, %c0_11] : memref<128x256xf32, #tpu.memory_space<vmem>>, vector<128x256xf32>
    tpu.vector_store %arg6[%c0_10, %c0_11], %13 {strides = array<i32>} : memref<128x256xf32, #tpu.memory_space<vmem>>, vector<128x256xf32>,
    return
  }
  func.func @transform_0(%arg0: i32, %arg1: i32, %arg2: i32) -> (i32, i32) {
    %c0_i32 = arith.constant 0 : i32
    return %arg0, %arg2 : i32, i32
  }
  func.func @transform_1(%arg0: i32, %arg1: i32, %arg2: i32) -> (i32, i32, i32) {
    %c0_i32 = arith.constant 0 : i32
    %c0_i32_0 = arith.constant 0 : i32
    return %arg1, %arg2, %c0_i32 : i32, i32, i32
  }
  func.func @transform_2(%arg0: i32, %arg1: i32, %arg2: i32) -> (i32, i32, i32) {
    %c0_i32 = arith.constant 0 : i32
    %c0_i32_0 = arith.constant 0 : i32
    %c0_i32_1 = arith.constant 0 : i32
    return %arg1, %c0_i32, %c0_i32_0 : i32, i32, i32
  }
  func.func @transform_3(%arg0: i32, %arg1: i32, %arg2: i32) -> (i32, i32) {
    %c0_i32 = arith.constant 0 : i32
    %c0_i32_0 = arith.constant 0 : i32
    return %arg0, %c0_i32 : i32, i32
  }
}

</mosaic_0001>

<bundles_post_ra>
// kernel: _lambda_.1
= control target key start
LH: loop header
LB: loop body
LE: loop exit
PB: predicated region body
PF: predicated region fallthrough
CT: control target
= control target key end

     0   :  { %8 = vsyncpa [#allocation3], 0  ;;  %s1746_s0 = inlined_call_operand.vmem [shape: bf16[512,256], index: 0, kind: input, shape index: {}]   ;;  %s1747_s1 = inlined_call_operand.vmem [shape: bf16[3,256,256], index: 1, kind: input, shape index: {}]   ;;  %s1748_s2 = inlined_call_operand.vmem [shape: f32[3,1,256], index: 2, kind: input, shape index: {}]   ;;  %s1749_s3 = inlined_call_operand.hbm [shape: f32[512,256], index: 3, kind: output, shape index: {}]  }
   0x1   :  { %10 = vsyncpa [#allocation3 + $0x1], 0  ;;  %s1410_s12 = smov 0   ;;  %s1412_s13 = smov 0  }
   0x2   :  { %s1414_s14 = smov 0   ;;  %s1416_s15 = smov 0  }
   0x3   :  { %s1418_s16 = smov 0   ;;  %s1420_s17 = smov 0  }
   0x4   :  { %s1422_s18 = smov 0   ;;  %s1424_s19 = smov 0  }
   0x5 LB: > { %s1042_s20 = sadd.s32 4294967295, %s1384_s19   ;;  %s1043_s21 = sadd.s32 4294967294, %s1384_s19   ;;  %s1384_s19 = sphi %s1424_s19, %s16_s19   ;;  %s1380_s18 = sphi %s1422_s18, %s1765_s18   ;;  %s1376_s17 = sphi %s1420_s17, %s1764_s17   ;;  %s1372_s16 = sphi %s1418_s16, %s1763_s16   ;;  %s1368_s15 = sphi %s1416_s15, %s1762_s15   ;;  %s1364_s14 = sphi %s1414_s14, %s1761_s14   ;;  %s1360_s13 = sphi %s1412_s13, %s1760_s13   ;;  %s1356_s12 = sphi %s1410_s12, %s1759_s12  }
   0x6   : > { %s31_s22 = sadd.s32 1, %s1376_s17  ;;  %s35_s23 = sadd.s32 1, %s1380_s18 }
   0x7   : > { %p33_p0 = scmp.ge.s32.totalorder %s31_s22, 3  ;;  %p134_p1 = scmp.ne.s32.totalorder %s1364_s14, %s1360_s13 }
   0x8   : > { %p135_p2 = scmp.eq.s32.totalorder %s1042_s20, 11  ;;  %p140_p4 = scmp.ne.s32.totalorder %s1360_s13, %s1356_s12 }
   0x9   : > { %s1767_s22 = smov (%p33_p0, %s31_s22), 0  ;;  %s1769_s23 = smov (!%p33_p0, %s35_s23), %s1380_s18 }
   0xa   : > { %1752 = sst [smem:[#allocation5_spill]] %s1767_s22  ;;  %p1459_p3 = por %p135_p2, %p134_p1 }
   0xb   : > { %p37_p5 = scmp.ge.s32.totalorder %s1769_s23, 4  ;;  %p141_p6 = scmp.eq.s32.totalorder %s1043_s21, 11 }
   0xc   : > { %p1046_p7 = scmp.ge.s32.totalorder %s1384_s19, 1  ;;  %p195_p8 = scmp.lt.s32.totalorder %s1384_s19, 13 }
   0xd   : > { %s1771_s23 = smov (%p37_p5, %s1769_s23), 0  ;;  %p1469_p9 = por %p141_p6, %p140_p4 }
   0xe   : > { %1754 = sst [smem:[#allocation6_spill]] %s1771_s23  ;;  %p196_p10 = pnand %p1046_p7, %p195_p8 }
   0xf   : > { %s121_s26 = ssub.s32 %s1380_s18, %s1771_s23  ;;  %s124_s27 = sadd.s32 1, %s1364_s14 }
  0x10   : > { %p122_p11 = scmp.eq.s32.totalorder %s121_s26, 0  ;;  %199 = sbr.rel (%p196_p10) target bundleno = 342 (0x156), region = 32 }
  0x11   : > { %s1750_s29 = sand.u32 (!%p196_p10), 1, %s1360_s13   ;;  %s1048_s30 = sshll.u32 (!%p196_p10), %s1372_s16, 4 }
  0x12   : > { %s1477_s28 = scalar_select %p122_p11, %s1364_s14, %s124_s27  }
  0x13   : > { %s1047_s4 = sshll.u32 (!%p196_p10), %s1750_s29, 8  ;;  %p240_p12 = scmp.lt.s32.totalorder (!%p196_p10), %s1048_s30, 63 }
  0x14   : > { %p251_p13 = scmp.lt.s32.totalorder (!%p196_p10), %s1368_s15, 2  ;;  %p266_p0 = scmp.eq.s32.totalorder (!%p196_p10), %s1368_s15, 0 }
  0x15   : > { %s1773_s30 = smov (!%p240_p12, %s1048_s30), 63  ;;  %s1501_s22 = scalar_lea.vmem [#allocation2], %s1047_s4  ;;  %v1386_v0 = vmov (%p266_p0), 0.0  }
  0x16   : > { %s252_s5 = scalar_select %p251_p13, %s1368_s15, 2  ;;  %272 = vst [vmem:[%s1501_s22] sm:$0xff] (%p266_p0), %v1386_v0  ;;  %273 = vst [vmem:[%s1501_s22 + $0x8] sm:$0xff] (%p266_p0), %v1386_v0 }
  0x17   : > { %s1109_s6 = sshll.u32 %s1773_s30, 3  ;;  %271 = sbr.rel (!%p266_p0) target bundleno = 38 (0x26), region = 36  ;;  %274 = vst [vmem:[%s1501_s22 + $0x10] sm:$0xff] (%p266_p0), %v1386_v0  ;;  %275 = vst [vmem:[%s1501_s22 + $0x18] sm:$0xff] (%p266_p0), %v1386_v0 }
  0x18   : > { %s1489_s9 = scalar_lea.vmem %s1746_s0, %s1109_s6  ;;  %s1110_s10 = sshll.u32 %s252_s5, 8  ;;  %276 = vst [vmem:[%s1501_s22 + $0x20] sm:$0xff] (%p266_p0), %v1386_v0  ;;  %277 = vst [vmem:[%s1501_s22 + $0x28] sm:$0xff] (%p266_p0), %v1386_v0 }
  0x19   : > { %s1494_s21 = scalar_lea.vmem %s1747_s1, %s1110_s10  ;;  %s1053_s26 = sshll.u32 %s252_s5, 1  ;;  %278 = vst [vmem:[%s1501_s22 + $0x30] sm:$0xff] (%p266_p0), %v1386_v0  ;;  %279 = vst [vmem:[%s1501_s22 + $0x38] sm:$0xff] (%p266_p0), %v1386_v0 }
  0x1a   : > { %s1499_s23 = scalar_lea.vmem %s1748_s2, %s1053_s26  ;;  %280 = vst [vmem:[%s1501_s22 + $0x40] sm:$0xff] (%p266_p0), %v1386_v0  ;;  %281 = vst [vmem:[%s1501_s22 + $0x48] sm:$0xff] (%p266_p0), %v1386_v0 }
  0x1b   : > { %282 = vst [vmem:[%s1501_s22 + $0x50] sm:$0xff] (%p266_p0), %v1386_v0  ;;  %283 = vst [vmem:[%s1501_s22 + $0x58] sm:$0xff] (%p266_p0), %v1386_v0 }
  0x1c   : > { %284 = vst [vmem:[%s1501_s22 + $0x60] sm:$0xff] %v1386_v0  ;;  %285 = vst [vmem:[%s1501_s22 + $0x68] sm:$0xff] %v1386_v0 }
  0x1d   : > { %286 = vst [vmem:[%s1501_s22 + $0x70] sm:$0xff] %v1386_v0  ;;  %287 = vst [vmem:[%s1501_s22 + $0x78] sm:$0xff] %v1386_v0 }
  0x1e   : > { %288 = vst [vmem:[%s1501_s22 + $0x80] sm:$0xff] %v1386_v0  ;;  %289 = vst [vmem:[%s1501_s22 + $0x88] sm:$0xff] %v1386_v0 }
  0x1f   : > { %290 = vst [vmem:[%s1501_s22 + $0x90] sm:$0xff] %v1386_v0  ;;  %291 = vst [vmem:[%s1501_s22 + $0x98] sm:$0xff] %v1386_v0 }
  0x20   : > { %292 = vst [vmem:[%s1501_s22 + $0xa0] sm:$0xff] %v1386_v0  ;;  %293 = vst [vmem:[%s1501_s22 + $0xa8] sm:$0xff] %v1386_v0 }
  0x21   : > { %294 = vst [vmem:[%s1501_s22 + $0xb0] sm:$0xff] %v1386_v0  ;;  %295 = vst [vmem:[%s1501_s22 + $0xb8] sm:$0xff] %v1386_v0 }
  0x22   : > { %296 = vst [vmem:[%s1501_s22 + $0xc0] sm:$0xff] %v1386_v0  ;;  %297 = vst [vmem:[%s1501_s22 + $0xc8] sm:$0xff] %v1386_v0 }
  0x23   : > { %298 = vst [vmem:[%s1501_s22 + $0xd0] sm:$0xff] %v1386_v0  ;;  %299 = vst [vmem:[%s1501_s22 + $0xd8] sm:$0xff] %v1386_v0 }
  0x24   : > { %300 = vst [vmem:[%s1501_s22 + $0xe0] sm:$0xff] %v1386_v0  ;;  %301 = vst [vmem:[%s1501_s22 + $0xe8] sm:$0xff] %v1386_v0 }
  0x25   : > { %302 = vst [vmem:[%s1501_s22 + $0xf0] sm:$0xff] %v1386_v0  ;;  %303 = vst [vmem:[%s1501_s22 + $0xf8] sm:$0xff] %v1386_v0 }
  0x26 PF: > { %v1220_v1 = vld [vmem:[%s1494_s21 + $0x74] ss:$8 sps:$4 sm:$0xff]   ;;  %v1222_v2 = vld [vmem:[%s1494_s21 + $0x70] ss:$8 sps:$4 sm:$0xff]   ;;  %v1223_v3 = vld [vmem:[%s1494_s21 + $0x64] ss:$8 sps:$4 sm:$0xff]   ;;  %v341_v49 = vlaneseq }
  0x27   : > { %735 = vmatprep.subr.bf16.mxu0 %v1220_v1  ;;  %1114 = vmatprep.subr.bf16.mxu1 %v1220_v1  ;;  %v1225_v4 = vld [vmem:[%s1494_s21 + $0x60] ss:$8 sps:$4 sm:$0xff]   ;;  %v1226_v5 = vld [vmem:[%s1494_s21 + $0x54] ss:$8 sps:$4 sm:$0xff]   ;;  %v1228_v6 = vld [vmem:[%s1494_s21 + $0x50] ss:$8 sps:$4 sm:$0xff]  }
  0x28   : > { %736 = vmatpush1.bf16.msra.mxu0 %v1222_v2  ;;  %1130 = vmatpush1.bf16.msra.mxu1 %v1222_v2  ;;  %v1229_v7 = vld [vmem:[%s1494_s21 + $0x44] ss:$8 sps:$4 sm:$0xff]   ;;  %v1231_v8 = vld [vmem:[%s1494_s21 + $0x40] ss:$8 sps:$4 sm:$0xff]   ;;  %v1232_v9 = vld [vmem:[%s1494_s21 + $0x34] ss:$8 sps:$4 sm:$0xff]  }
  0x29   : > { %737 = vmatprep.subr.bf16.mxu0 %v1223_v3  ;;  %1115 = vmatprep.subr.bf16.mxu1 %v1223_v3  ;;  %v1234_v10 = vld [vmem:[%s1494_s21 + $0x30] ss:$8 sps:$4 sm:$0xff]   ;;  %v1235_v11 = vld [vmem:[%s1494_s21 + $0x24] ss:$8 sps:$4 sm:$0xff]   ;;  %v1237_v12 = vld [vmem:[%s1494_s21 + $0x20] ss:$8 sps:$4 sm:$0xff]  }
  0x2a   : > { %v1238_v13 = vld [vmem:[%s1494_s21 + $0x14] ss:$8 sps:$4 sm:$0xff]   ;;  %v1270_v14 = vld [vmem:[%s1489_s9 + $0x4] ss:$8 sps:$4 sm:$0xff]   ;;  %v1240_v15 = vld [vmem:[%s1494_s21 + $0x10] ss:$8 sps:$4 sm:$0xff]  }
  0x2b   : > { %v1273_v16 = vld [vmem:[%s1489_s9 + $0x44] ss:$8 sps:$4 sm:$0xff]   ;;  %767 = vmatprep.mubr.bf16.mxu0 %v1270_v14  ;;  %v1243_v18 = vld [vmem:[%s1494_s21] ss:$8 sps:$4 sm:$0xff]   ;;  %v1244_v19 = vld [vmem:[%s1494_s21 + $0xf4] ss:$8 sps:$4 sm:$0xff]  }
  0x2c   : > { %738 = vmatpush1.bf16.msra.mxu0 %v1225_v4  ;;  %1131 = vmatpush1.bf16.msra.mxu1 %v1225_v4  ;;  %v1241_v17 = vld [vmem:[%s1494_s21 + $0x4] ss:$8 sps:$4 sm:$0xff]   ;;  %v1246_v20 = vld [vmem:[%s1494_s21 + $0xf0] ss:$8 sps:$4 sm:$0xff]   ;;  %v1249_v22 = vld [vmem:[%s1494_s21 + $0xe0] ss:$8 sps:$4 sm:$0xff]  }
  0x2d   : > { %739 = vmatprep.subr.bf16.mxu0 %v1226_v5  ;;  %1116 = vmatprep.subr.bf16.mxu1 %v1226_v5  ;;  %v1247_v21 = vld [vmem:[%s1494_s21 + $0xe4] ss:$8 sps:$4 sm:$0xff]   ;;  %v1250_v23 = vld [vmem:[%s1494_s21 + $0xd4] ss:$8 sps:$4 sm:$0xff]   ;;  %v1252_v24 = vld [vmem:[%s1494_s21 + $0xd0] ss:$8 sps:$4 sm:$0xff]  }
  0x2e   : > { %807 = vmatprep.mubr.bf16.mxu1 %v1273_v16  ;;  %v1253_v25 = vld [vmem:[%s1494_s21 + $0xc4] ss:$8 sps:$4 sm:$0xff]   ;;  %v1255_v26 = vld [vmem:[%s1494_s21 + $0xc0] ss:$8 sps:$4 sm:$0xff]   ;;  %v1256_v27 = vld [vmem:[%s1494_s21 + $0xb4] ss:$8 sps:$4 sm:$0xff]  }
  0x2f   : > { %v1258_v28 = vld [vmem:[%s1494_s21 + $0xb0] ss:$8 sps:$4 sm:$0xff]   ;;  %v1259_v29 = vld [vmem:[%s1494_s21 + $0xa4] ss:$8 sps:$4 sm:$0xff]   ;;  %v1261_v30 = vld [vmem:[%s1494_s21 + $0xa0] ss:$8 sps:$4 sm:$0xff]  }
  0x30   : > { %740 = vmatpush1.bf16.msra.mxu0 %v1228_v6  ;;  %1132 = vmatpush1.bf16.msra.mxu1 %v1228_v6  ;;  %v1262_v31 = vld [vmem:[%s1494_s21 + $0x94] ss:$8 sps:$4 sm:$0xff]   ;;  %v1264_v32 = vld [vmem:[%s1494_s21 + $0x90] ss:$8 sps:$4 sm:$0xff]   ;;  %v1265_v33 = vld [vmem:[%s1494_s21 + $0x84] ss:$8 sps:$4 sm:$0xff]  }
  0x31   : > { %741 = vmatprep.subr.bf16.mxu0 %v1229_v7  ;;  %1117 = vmatprep.subr.bf16.mxu1 %v1229_v7  ;;  %v1267_v34 = vld [vmem:[%s1494_s21 + $0x80] ss:$8 sps:$4 sm:$0xff]   ;;  %v1274_v37 = vld [vmem:[%s1489_s9 + $0x14] ss:$8 sps:$4 sm:$0xff]   ;;  %v1278_v39 = vld [vmem:[%s1489_s9 + $0x10] ss:$8 sps:$4 sm:$0xff]  }
  0x32   : > { %v1268_v35 = vld [vmem:[%s1489_s9] ss:$8 sps:$4 sm:$0xff]   ;;  %v1276_v38 = vld [vmem:[%s1489_s9 + $0x54] ss:$8 sps:$4 sm:$0xff]   ;;  %v1279_v40 = vld [vmem:[%s1489_s9 + $0x50] ss:$8 sps:$4 sm:$0xff]  }
  0x33   : > { %v1271_v36 = vld [vmem:[%s1489_s9 + $0x40] ss:$8 sps:$4 sm:$0xff]   ;;  %v1280_v41 = vld [vmem:[%s1489_s9 + $0x24] ss:$8 sps:$4 sm:$0xff]   ;;  %v1286_v45 = vld [vmem:[%s1489_s9 + $0x34] ss:$8 sps:$4 sm:$0xff]  }
  0x34   : > { %742 = vmatpush1.bf16.msra.mxu0 %v1231_v8  ;;  %1133 = vmatpush1.bf16.msra.mxu1 %v1231_v8  ;;  %v1282_v42 = vld [vmem:[%s1489_s9 + $0x64] ss:$8 sps:$4 sm:$0xff]   ;;  %v1284_v43 = vld [vmem:[%s1489_s9 + $0x20] ss:$8 sps:$4 sm:$0xff]   ;;  %v1288_v46 = vld [vmem:[%s1489_s9 + $0x74] ss:$8 sps:$4 sm:$0xff]  }
  0x35   : > { %743 = vmatprep.subr.bf16.mxu0 %v1232_v9  ;;  %1118 = vmatprep.subr.bf16.mxu1 %v1232_v9  ;;  %v1285_v44 = vld [vmem:[%s1489_s9 + $0x60] ss:$8 sps:$4 sm:$0xff]   ;;  %v1290_v47 = vld [vmem:[%s1489_s9 + $0x30] ss:$8 sps:$4 sm:$0xff]   ;;  %v342_v50 = vshrl.u32 %v341_v49, 7  ;;  %s1113_s15 = sshll.u32 %s1372_s16, 12 }
  0x36   : > { %v1291_v48 = vld [vmem:[%s1489_s9 + $0x70] ss:$8 sps:$4 sm:$0xff]   ;;  %v339_v52 = vld [vmem:[%s1499_s23] sm:$0x3]  ;;  %v308_v58 = vld [vmem:[%s1501_s22 + $0x8] sm:$0xff]  ;;  %s927_s23 = sshll.u32 %s1501_s22, 4  ;;  %s1685_s4 = scalar_lea.hbm %s1749_s3, %s1113_s15  ;;  %s1687_s23 = int_to_ptr.vmem [resolvable:$true] %s927_s23 }
  0x37   : > { %v343_v51 = vsub.s32 0, %v342_v50  ;;  %v347_v53 = vsub.s32 1, %v342_v50  ;;  %v307_v55 = vld [vmem:[%s1501_s22] sm:$0xff]  ;;  %v324_v59 = vld [vmem:[%s1501_s22 + $0x88] sm:$0xff]  ;;  %v309_v62 = vld [vmem:[%s1501_s22 + $0x10] sm:$0xff]  ;;  %s1756_s16 = sand.u32 1, %s1360_s13  }
  0x38   : > { %744 = vmatpush1.bf16.msra.mxu0 %v1234_v10  ;;  %1134 = vmatpush1.bf16.msra.mxu1 %v1234_v10  ;;  %v323_v56 = vld [vmem:[%s1501_s22 + $0x80] sm:$0xff]  ;;  %v325_v63 = vld [vmem:[%s1501_s22 + $0x90] sm:$0xff]  ;;  %v310_v4 = vld [vmem:[%s1501_s22 + $0x18] sm:$0xff]  ;;  %s1695_s5 = scalar_lea.sflag [#allocation3], %s1756_s16  ;;  %s1292_s6 = scalar_lea.vmem %s1687_s23, 4096 }
  0x39   : > { %745 = vmatprep.subr.bf16.mxu0 %v1235_v11  ;;  %1119 = vmatprep.subr.bf16.mxu1 %v1235_v11  ;;  %v1584_v54 = vrot.slane %v339_v52, %v343_v51  ;;  %v1588_v57 = vrot.slane %v339_v52, %v347_v53  ;;  %v326_v5 = vld [vmem:[%s1501_s22 + $0x98] sm:$0xff]  ;;  %v316_v52 = vld [vmem:[%s1501_s22 + $0x48] sm:$0xff]  ;;  %p1293_p1 = scmp.ne.s32.totalorder %s1687_s23, %s1292_s6  ;;  %s1387_s7 = smov [#allocation2]  }
  0x3a   : > { %v332_v53 = vld [vmem:[%s1501_s22 + $0xc8] sm:$0xff]  ;;  %s1296_s8 = sshll.u32 %s1387_s7, 4  ;;  %s1297_s8 = int_to_ptr.vmem [resolvable:$false] %s1296_s8 }
  0x3b   : > { %v351_v60 = vadd.f32 %v1584_v54, %v307_v55  ;;  %v367_v61 = vadd.f32 %v1584_v54, %v323_v56  ;;  %v352_v0 = vadd.f32 %v1588_v57, %v308_v58  ;;  %v368_v1 = vadd.f32 %v1588_v57, %v324_v59  ;;  %p1294_p2 = pnand %p1293_p1, %p1459_p3  ;;  %s1298_s9 = scalar_lea.vmem %s1297_s8, 8192 }
  0x3c   : > { %746 = vmatpush1.bf16.msra.mxu0 %v1237_v12  ;;  %1135 = vmatpush1.bf16.msra.mxu1 %v1237_v12  ;;  %v353_v8 = vadd.f32 %v1584_v54, %v309_v62  ;;  %v369_v9 = vadd.f32 %v1584_v54, %v325_v63  ;;  %v311_v12 = vld [vmem:[%s1501_s22 + $0x20] sm:$0xff]  ;;  %v354_v16 = vadd.f32 %v1588_v57, %v310_v4  ;;  %v317_v62 = vld [vmem:[%s1501_s22 + $0x50] sm:$0xff]  ;;  %p1299_p5 = scmp.lt.s32.totalorder %s1687_s23, %s1297_s8  ;;  %p1300_p6 = scmp.lt.s32.totalorder %s1298_s9, %s1292_s6 }
  0x3d   : > { %747 = vmatprep.subr.bf16.mxu0 %v1238_v13  ;;  %1120 = vmatprep.subr.bf16.mxu1 %v1238_v13  ;;  %v327_v13 = vld [vmem:[%s1501_s22 + $0xa0] sm:$0xff]  ;;  %v333_v63 = vld [vmem:[%s1501_s22 + $0xd0] sm:$0xff]  ;;  %p1295_p4 = pneg %p1294_p2 }
  0x3e   : > { %p1301_p7 = por %p1300_p6, %p1299_p5 }
  0x40   : > { %748 = vmatpush1.bf16.msra.mxu0 %v1240_v15  ;;  %1136 = vmatpush1.bf16.msra.mxu1 %v1240_v15  ;;  %p1302_p8 = pnand %p1301_p7, %p1295_p4 }
  0x41   : > { %749 = vmatprep.subr.bf16.mxu0 %v1241_v17  ;;  %1121 = vmatprep.subr.bf16.mxu1 %v1241_v17  ;;  %v370_v17 = vadd.f32 %v1588_v57, %v326_v5 }
  0x44   : > { %750 = vmatpush1.bf16.msra.mxu0 %v1243_v18  ;;  %1137 = vmatpush1.bf16.msra.mxu1 %v1243_v18 }
  0x45   : > { %751 = vmatprep.subr.bf16.mxu0 %v1244_v19  ;;  %1122 = vmatprep.subr.bf16.mxu1 %v1244_v19 }
  0x48   : > { %752 = vmatpush2.bf16.msra.mxu0 %v1246_v20  ;;  %1138 = vmatpush2.bf16.msra.mxu1 %v1246_v20  ;;  %v312_v20 = vld [vmem:[%s1501_s22 + $0x28] sm:$0xff] }
  0x49   : > { %753 = vmatprep.subr.bf16.mxu0 %v1247_v21  ;;  %1123 = vmatprep.subr.bf16.mxu1 %v1247_v21  ;;  %v328_v21 = vld [vmem:[%s1501_s22 + $0xa8] sm:$0xff] }
  0x4c   : > { %754 = vmatpush2.bf16.msra.mxu0 %v1249_v22  ;;  %1139 = vmatpush2.bf16.msra.mxu1 %v1249_v22 }
  0x4d   : > { %755 = vmatprep.subr.bf16.mxu0 %v1250_v23  ;;  %1124 = vmatprep.subr.bf16.mxu1 %v1250_v23 }
  0x50   : > { %756 = vmatpush2.bf16.msra.mxu0 %v1252_v24  ;;  %1140 = vmatpush2.bf16.msra.mxu1 %v1252_v24  ;;  %v355_v24 = vadd.f32 %v1584_v54, %v311_v12 }
  0x51   : > { %757 = vmatprep.subr.bf16.mxu0 %v1253_v25  ;;  %1125 = vmatprep.subr.bf16.mxu1 %v1253_v25  ;;  %v371_v25 = vadd.f32 %v1584_v54, %v327_v13 }
  0x54   : > { %758 = vmatpush2.bf16.msra.mxu0 %v1255_v26  ;;  %1141 = vmatpush2.bf16.msra.mxu1 %v1255_v26 }
  0x55   : > { %759 = vmatprep.subr.bf16.mxu0 %v1256_v27  ;;  %1126 = vmatprep.subr.bf16.mxu1 %v1256_v27 }
  0x58   : > { %760 = vmatpush2.bf16.msra.mxu0 %v1258_v28  ;;  %1142 = vmatpush2.bf16.msra.mxu1 %v1258_v28  ;;  %v313_v28 = vld [vmem:[%s1501_s22 + $0x30] sm:$0xff] }
  0x59   : > { %761 = vmatprep.subr.bf16.mxu0 %v1259_v29  ;;  %1127 = vmatprep.subr.bf16.mxu1 %v1259_v29  ;;  %v329_v29 = vld [vmem:[%s1501_s22 + $0xb0] sm:$0xff] }
  0x5c   : > { %762 = vmatpush2.bf16.msra.mxu0 %v1261_v30  ;;  %1143 = vmatpush2.bf16.msra.mxu1 %v1261_v30 }
  0x5d   : > { %763 = vmatprep.subr.bf16.mxu0 %v1262_v31  ;;  %1128 = vmatprep.subr.bf16.mxu1 %v1262_v31 }
  0x60   : > { %764 = vmatpush2.bf16.msra.mxu0 %v1264_v32  ;;  %1144 = vmatpush2.bf16.msra.mxu1 %v1264_v32  ;;  %v356_v32 = vadd.f32 %v1588_v57, %v312_v20 }
  0x61   : > { %765 = vmatprep.subr.bf16.mxu0 %v1265_v33  ;;  %1129 = vmatprep.subr.bf16.mxu1 %v1265_v33  ;;  %v372_v33 = vadd.f32 %v1588_v57, %v328_v21 }
  0x64   : > { %766 = vmatpush2.bf16.msra.mxu0 %v1267_v34  ;;  %1145 = vmatpush2.bf16.msra.mxu1 %v1267_v34 }
  0x67   : > { %768 = vmatmul.mubr.bf16.vlgmr.msra.gmra.mxu0 %v1268_v35  ;;  %808 = vmatmul.mubr.bf16.vlgmr.msra.gmra.mxu1 %v1271_v36  ;;  %v314_v36 = vld [vmem:[%s1501_s22 + $0x38] sm:$0xff] }
  0x68   : > { %777 = vmatprep.mubr.bf16.mxu0 %v1274_v37  ;;  %817 = vmatprep.mubr.bf16.mxu1 %v1276_v38  ;;  %v330_v37 = vld [vmem:[%s1501_s22 + $0xb8] sm:$0xff] }
  0x69   : > { %v374_v49 = vadd.f32 %v1588_v57, %v330_v37 }
  0x6f   : > { %778 = vmatmul.mubr.bf16.gmra.mxu0 %v1278_v39  ;;  %818 = vmatmul.mubr.bf16.gmra.mxu1 %v1279_v40  ;;  %v357_v40 = vadd.f32 %v1584_v54, %v313_v28 }
  0x70   : > { %787 = vmatprep.mubr.bf16.mxu0 %v1280_v41  ;;  %827 = vmatprep.mubr.bf16.mxu1 %v1282_v42  ;;  %v373_v41 = vadd.f32 %v1584_v54, %v329_v29 }
  0x77   : > { %788 = vmatmul.mubr.bf16.gmra.mxu0 %v1284_v43  ;;  %828 = vmatmul.mubr.bf16.gmra.mxu1 %v1285_v44  ;;  %v315_v44 = vld [vmem:[%s1501_s22 + $0x40] sm:$0xff] }
  0x78   : > { %797 = vmatprep.mubr.bf16.mxu0 %v1286_v45  ;;  %837 = vmatprep.mubr.bf16.mxu1 %v1288_v46  ;;  %v331_v45 = vld [vmem:[%s1501_s22 + $0xc0] sm:$0xff]  ;;  %v359_v58 = vadd.f32 %v1584_v54, %v315_v44 }
  0x79   : > { %v375_v59 = vadd.f32 %v1584_v54, %v331_v45 }
  0x7f   : > { %798 = vmatmul.mubr.bf16.gmra.mxu0 %v1290_v47  ;;  %838 = vmatmul.mubr.bf16.gmra.mxu1 %v1291_v48  ;;  %v358_v48 = vadd.f32 %v1588_v57, %v314_v36 }
 0x127   : > { %v769_v2 = vpop.f32.mrf.mxu0  ;;  %v809_v3 = vpop.f32.mrf.mxu1 }
 0x128   : > { %v848_v6 = vadd.f32 %v769_v2, %v351_v60  ;;  %v864_v7 = vadd.f32 %v809_v3, %v367_v61  ;;  %v360_v2 = vadd.f32 %v1588_v57, %v316_v52  ;;  %v376_v3 = vadd.f32 %v1588_v57, %v332_v53 }
 0x129   : > { %v771_v10 = vpop.f32.mrf.mxu0  ;;  %v811_v11 = vpop.f32.mrf.mxu1 }
 0x12a   : > { %880 = vst [vmem:[%s1501_s22] sm:$0xff] %v848_v6  ;;  %896 = vst [vmem:[%s1501_s22 + $0x80] sm:$0xff] %v864_v7  ;;  %v849_v14 = vadd.f32 %v771_v10, %v352_v0  ;;  %v865_v15 = vadd.f32 %v811_v11, %v368_v1  ;;  %v318_v6 = vld [vmem:[%s1501_s22 + $0x58] sm:$0xff]  ;;  %v361_v10 = vadd.f32 %v1584_v54, %v317_v62 }
 0x12b   : > { %v773_v18 = vpop.f32.mrf.mxu0  ;;  %v813_v19 = vpop.f32.mrf.mxu1  ;;  %v334_v7 = vld [vmem:[%s1501_s22 + $0xd8] sm:$0xff]  ;;  %v377_v11 = vadd.f32 %v1584_v54, %v333_v63 }
 0x12c   : > { %881 = vst [vmem:[%s1501_s22 + $0x8] sm:$0xff] %v849_v14  ;;  %897 = vst [vmem:[%s1501_s22 + $0x88] sm:$0xff] %v865_v15  ;;  %v850_v22 = vadd.f32 %v773_v18, %v353_v8  ;;  %v866_v23 = vadd.f32 %v813_v19, %v369_v9  ;;  %v319_v14 = vld [vmem:[%s1501_s22 + $0x60] sm:$0xff]  ;;  %v362_v18 = vadd.f32 %v1588_v57, %v318_v6 }
 0x12d   : > { %v775_v26 = vpop.f32.mrf.mxu0  ;;  %v815_v27 = vpop.f32.mrf.mxu1  ;;  %v335_v15 = vld [vmem:[%s1501_s22 + $0xe0] sm:$0xff]  ;;  %v378_v19 = vadd.f32 %v1588_v57, %v334_v7 }
 0x12e   : > { %882 = vst [vmem:[%s1501_s22 + $0x10] sm:$0xff] %v850_v22  ;;  %898 = vst [vmem:[%s1501_s22 + $0x90] sm:$0xff] %v866_v23  ;;  %v851_v30 = vadd.f32 %v775_v26, %v354_v16  ;;  %v867_v31 = vadd.f32 %v815_v27, %v370_v17  ;;  %v320_v22 = vld [vmem:[%s1501_s22 + $0x68] sm:$0xff]  ;;  %v363_v26 = vadd.f32 %v1584_v54, %v319_v14 }
 0x12f   : > { %v779_v34 = vpop.f32.mrf.mxu0  ;;  %v819_v35 = vpop.f32.mrf.mxu1  ;;  %v336_v23 = vld [vmem:[%s1501_s22 + $0xe8] sm:$0xff]  ;;  %v379_v27 = vadd.f32 %v1584_v54, %v335_v15 }
 0x130   : > { %883 = vst [vmem:[%s1501_s22 + $0x18] sm:$0xff] %v851_v30  ;;  %899 = vst [vmem:[%s1501_s22 + $0x98] sm:$0xff] %v867_v31  ;;  %v852_v38 = vadd.f32 %v779_v34, %v355_v24  ;;  %v868_v39 = vadd.f32 %v819_v35, %v371_v25  ;;  %v321_v30 = vld [vmem:[%s1501_s22 + $0x70] sm:$0xff]  ;;  %v364_v34 = vadd.f32 %v1588_v57, %v320_v22 }
 0x131   : > { %v781_v42 = vpop.f32.mrf.mxu0  ;;  %v821_v43 = vpop.f32.mrf.mxu1  ;;  %v337_v31 = vld [vmem:[%s1501_s22 + $0xf0] sm:$0xff]  ;;  %v380_v35 = vadd.f32 %v1588_v57, %v336_v23 }
 0x132   : > { %884 = vst [vmem:[%s1501_s22 + $0x20] sm:$0xff] %v852_v38  ;;  %900 = vst [vmem:[%s1501_s22 + $0xa0] sm:$0xff] %v868_v39  ;;  %v853_v46 = vadd.f32 %v781_v42, %v356_v32  ;;  %v869_v47 = vadd.f32 %v821_v43, %v372_v33  ;;  %v322_v38 = vld [vmem:[%s1501_s22 + $0x78] sm:$0xff]  ;;  %v365_v42 = vadd.f32 %v1584_v54, %v321_v30 }
 0x133   : > { %v783_v50 = vpop.f32.mrf.mxu0  ;;  %v823_v51 = vpop.f32.mrf.mxu1  ;;  %v338_v39 = vld [vmem:[%s1501_s22 + $0xf8] sm:$0xff]  ;;  %v381_v43 = vadd.f32 %v1584_v54, %v337_v31 }
 0x134   : > { %885 = vst [vmem:[%s1501_s22 + $0x28] sm:$0xff] %v853_v46  ;;  %901 = vst [vmem:[%s1501_s22 + $0xa8] sm:$0xff] %v869_v47  ;;  %v854_v55 = vadd.f32 %v783_v50, %v357_v40  ;;  %v870_v56 = vadd.f32 %v823_v51, %v373_v41 }
 0x135   : > { %v785_v60 = vpop.f32.mrf.mxu0  ;;  %v825_v61 = vpop.f32.mrf.mxu1 }
 0x136   : > { %886 = vst [vmem:[%s1501_s22 + $0x30] sm:$0xff] %v854_v55  ;;  %902 = vst [vmem:[%s1501_s22 + $0xb0] sm:$0xff] %v870_v56  ;;  %v855_v0 = vadd.f32 %v785_v60, %v358_v48  ;;  %v871_v1 = vadd.f32 %v825_v61, %v374_v49  ;;  %v366_v48 = vadd.f32 %v1588_v57, %v322_v38 }
 0x137   : > { %v789_v4 = vpop.f32.mrf.mxu0  ;;  %v829_v5 = vpop.f32.mrf.mxu1  ;;  %v382_v49 = vadd.f32 %v1588_v57, %v338_v39 }
 0x138   : > { %887 = vst [vmem:[%s1501_s22 + $0x38] sm:$0xff] %v855_v0  ;;  %903 = vst [vmem:[%s1501_s22 + $0xb8] sm:$0xff] %v871_v1  ;;  %v856_v8 = vadd.f32 %v789_v4, %v359_v58  ;;  %v872_v9 = vadd.f32 %v829_v5, %v375_v59 }
 0x139   : > { %v791_v12 = vpop.f32.mrf.mxu0  ;;  %v831_v13 = vpop.f32.mrf.mxu1 }
 0x13a   : > { %888 = vst [vmem:[%s1501_s22 + $0x40] sm:$0xff] %v856_v8  ;;  %904 = vst [vmem:[%s1501_s22 + $0xc0] sm:$0xff] %v872_v9  ;;  %v857_v16 = vadd.f32 %v791_v12, %v360_v2  ;;  %v873_v17 = vadd.f32 %v831_v13, %v376_v3 }
 0x13b   : > { %v793_v20 = vpop.f32.mrf.mxu0  ;;  %v833_v21 = vpop.f32.mrf.mxu1 }
 0x13c   : > { %889 = vst [vmem:[%s1501_s22 + $0x48] sm:$0xff] %v857_v16  ;;  %905 = vst [vmem:[%s1501_s22 + $0xc8] sm:$0xff] %v873_v17  ;;  %v858_v24 = vadd.f32 %v793_v20, %v361_v10  ;;  %v874_v25 = vadd.f32 %v833_v21, %v377_v11 }
 0x13d   : > { %v795_v28 = vpop.f32.mrf.mxu0  ;;  %v835_v29 = vpop.f32.mrf.mxu1 }
 0x13e   : > { %890 = vst [vmem:[%s1501_s22 + $0x50] sm:$0xff] %v858_v24  ;;  %906 = vst [vmem:[%s1501_s22 + $0xd0] sm:$0xff] %v874_v25  ;;  %v859_v32 = vadd.f32 %v795_v28, %v362_v18  ;;  %v875_v33 = vadd.f32 %v835_v29, %v378_v19 }
 0x13f   : > { %v799_v36 = vpop.f32.mrf.mxu0  ;;  %v839_v37 = vpop.f32.mrf.mxu1 }
 0x140   : > { %891 = vst [vmem:[%s1501_s22 + $0x58] sm:$0xff] %v859_v32  ;;  %907 = vst [vmem:[%s1501_s22 + $0xd8] sm:$0xff] %v875_v33  ;;  %v860_v40 = vadd.f32 %v799_v36, %v363_v26  ;;  %v876_v41 = vadd.f32 %v839_v37, %v379_v27 }
 0x141   : > { %v801_v44 = vpop.f32.mrf.mxu0  ;;  %v841_v45 = vpop.f32.mrf.mxu1 }
 0x142   : > { %892 = vst [vmem:[%s1501_s22 + $0x60] sm:$0xff] %v860_v40  ;;  %908 = vst [vmem:[%s1501_s22 + $0xe0] sm:$0xff] %v876_v41  ;;  %v861_v46 = vadd.f32 %v801_v44, %v364_v34  ;;  %v877_v47 = vadd.f32 %v841_v45, %v380_v35 }
 0x143   : > { %v803_v50 = vpop.f32.mrf.mxu0  ;;  %v843_v51 = vpop.f32.mrf.mxu1 }
 0x144   : > { %893 = vst [vmem:[%s1501_s22 + $0x68] sm:$0xff] %v861_v46  ;;  %909 = vst [vmem:[%s1501_s22 + $0xe8] sm:$0xff] %v877_v47  ;;  %v862_v54 = vadd.f32 %v803_v50, %v365_v42  ;;  %v878_v52 = vadd.f32 %v843_v51, %v381_v43 }
 0x145   : > { %v805_v53 = vpop.f32.mrf.mxu0  ;;  %v845_v55 = vpop.f32.mrf.mxu1 }
 0x146   : > { %894 = vst [vmem:[%s1501_s22 + $0x70] sm:$0xff] %v862_v54  ;;  %910 = vst [vmem:[%s1501_s22 + $0xf0] sm:$0xff] %v878_v52  ;;  %v863_v57 = vadd.f32 %v805_v53, %v366_v48  ;;  %v879_v56 = vadd.f32 %v845_v55, %v382_v49 }
 0x148   : > { %895 = vst [vmem:[%s1501_s22 + $0x78] sm:$0xff] %v863_v57  ;;  %911 = vst [vmem:[%s1501_s22 + $0xf8] sm:$0xff] %v879_v56 }
 0x149   : > { %1305 = shalt.err (!%p1302_p8)
}
 0x14a   : > { %s1306_s22 = scalar_lea.hbm %s1685_s4, 4096  ;;  %s1310_s20 = scalar_lea.hbm %s1749_s3, 16384 }
 0x14b   : > { %p1307_p10 = scmp.ne.s32.totalorder %s1685_s4, %s1306_s22  ;;  %p1311_p13 = scmp.lt.s32.totalorder %s1685_s4, %s1749_s3 }
 0x14c   : > { %p1312_p0 = scmp.lt.s32.totalorder %s1310_s20, %s1306_s22 }
 0x14d   : > { %p1308_p11 = pnand %p1307_p10, %p1459_p3 }
 0x14e   : > { %p1313_p1 = por %p1312_p0, %p1311_p13 }
 0x14f   : > { %p1309_p12 = pneg %p1308_p11 }
 0x151   : > { %p1314_p2 = pnand %p1313_p1, %p1309_p12 }
 0x153   : > { %1317 = shalt.err (!%p1314_p2)
}
 0x154   : > { %s1388_s27 = smov 256   ;;  %s1389_s15 = smov 16  }
 0x155   : > { %1146 = dma.vmem_to_hbm [thread:$0]  (%p1459_p3), %s1687_s23, 4096, %s1685_s4, %s1695_s5, %s1388_s27, %s1388_s27, %s1389_s15  }
 0x156 PF: > { %p1152_p4 = scmp.ge.s32.totalorder %s1384_s19, 2  ;;  %s942_s29 = sand.u32 1, %s1356_s12  }
 0x157   : > { %s943_s30 = scalar_lea.sflag [#allocation3], %s942_s29 }
 0x158   : > { %p1149_p5 = pnand %p1152_p4, %p1469_p9 }
 0x15a   : > { %p1150_p6 = pneg %p1149_p5 }
 0x15c   : > { %1351 = dma.done.wait (%p1150_p6), %s943_s30, 4096  }
 0x15d   : > { %1353 = vsyncadd (%p1150_p6), %s943_s30, 4294963200  ;;  %s16_s19 = sadd.s32 1, %s1384_s19   ;;  %s1757_s24 = sld [smem:[#allocation5_spill]] }
 0x15e   : > { %p13_p7 = scmp.ge.s32.totalorder %s16_s19, 14   ;;  %s1758_s23 = sld [smem:[#allocation6_spill]] }
 0x15f   : > { %s1759_s12 = smov %s1360_s13  ;;  %s1760_s13 = smov %s1364_s14 }
 0x160   : > { %s1761_s14 = smov %s1477_s28  ;;  %s1762_s15 = smov %s1376_s17 }
 0x161   : > { %s1763_s16 = smov %s1380_s18  ;;  %15 = sbr.rel (!%p13_p7) target bundleno = 5 (0x5), region = 81 }
 0x163   : > { %s1764_s17 = smov %s1757_s24 }
 0x164   : > { %s1765_s18 = smov %s1758_s23 }
 0x166   :  { %948 = vsyncpa [#allocation3], 1 }
 0x167   :  { %950 = vsyncpa [#allocation3 + $0x1], 1 }

</bundles_post_ra>
